<compile_context>
chip_gen: v5e
topology: v5e:2x2
jax: 0.10.0
libtpu: 0.0.40
codegen_flags: <defaults>
</compile_context>

<pallas_src>
import functools

import jax
import jax.numpy as jnp
from jax import lax
from jax.experimental import pallas as pl
from jax.experimental.pallas import tpu as pltpu


def _bpr_loss_rows(u_ref, p_ref, n_ref, *, gamma):
    """Per-row -log(gamma + sigmoid(<u, p - n>)) for the current tile."""
    u = u_ref[...].astype(jnp.float32)                        # (tile_b, d)
    p = p_ref[...].astype(jnp.float32)
    n = n_ref[...].astype(jnp.float32)
    # Fused form: a single cross-lane reduce instead of two.
    diff = jnp.sum(u * (p - n), axis=1, keepdims=True)        # (tile_b, 1)
    return -jnp.log(jnp.float32(gamma) + jax.nn.sigmoid(diff))


def _bpr_kernel_reduce(u_ref, p_ref, n_ref, out_ref, *,
                       gamma, inv_count, b, tile_b):
    """reduction='mean'|'sum': running scalar sum kept in the SMEM output."""
    i = pl.program_id(0)

    @pl.when(i == 0)
    def _init():
        out_ref[0, 0] = jnp.float32(0.0)

    loss = _bpr_loss_rows(u_ref, p_ref, n_ref, gamma=gamma)   # (tile_b, 1)

    if b % tile_b != 0:
        # Mask out-of-range rows of the (padded) last tile out of the sum.
        # jnp.where is a select, so garbage/NaN in padded rows is harmless.
        rows = i * tile_b + lax.broadcasted_iota(jnp.int32, (tile_b, 1), 0)
        loss = jnp.where(rows < b, loss, jnp.float32(0.0))

    out_ref[0, 0] += jnp.sum(loss)

    if inv_count != 1.0:  # 'mean': finalize with a reciprocal multiply.
        @pl.when(i == pl.num_programs(0) - 1)
        def _finalize():
            out_ref[0, 0] = out_ref[0, 0] * jnp.float32(inv_count)


def _bpr_kernel_none(u_ref, p_ref, n_ref, out_ref, *, gamma):
    """reduction='none': write the per-row losses for this tile."""
    out_ref[...] = _bpr_loss_rows(u_ref, p_ref, n_ref, gamma=gamma)
    # TODO(synk): a lane-dense (1, tile_b) output block would avoid masked
    # vst.msk stores, but the (tile_b,1)->(1,tile_b) sublane->lane relayout is
    # not guaranteed to lower cheaply on all Mosaic versions and output traffic
    # is ~1/d of input traffic here, so the column layout is kept.


def _pick_tile_b(b, d, itemsize):
    # Keep 3 inputs x 2 pipeline buffers x TILE_B x d x itemsize around 12 MiB:
    # ~2 MiB per DMA block (on the measured 85%+ roofline plateau) while staying
    # well under the 32 MiB scoped-VMEM limit we request, on every generation.
    budget_bytes = 12 * 1024 * 1024
    rows = budget_bytes // (3 * 2 * d * itemsize)
    tile = max(8, (int(rows) // 8) * 8)
    if b <= tile:
        return b  # single block covering the full (possibly ragged) batch
    return tile


def bpr_loss(users_emb, pos_emb, neg_emb, *, gamma=1e-10, reduction="mean"):
    assert reduction in ("mean", "sum", "none")
    assert users_emb.shape == pos_emb.shape == neg_emb.shape
    assert users_emb.ndim == 2
    b, d = users_emb.shape
    itemsize = jnp.dtype(users_emb.dtype).itemsize

    tile_b = _pick_tile_b(b, d, itemsize)
    num_tiles = pl.cdiv(b, tile_b)
    padded_b = num_tiles * tile_b

    in_specs = [pl.BlockSpec((tile_b, d), lambda i: (i, 0))] * 3

    cost = pl.CostEstimate(
        flops=4 * b * d,
        transcendentals=2 * b,
        bytes_accessed=3 * b * d * itemsize
        + (b * 4 if reduction == "none" else 4),
    )

    if reduction == "none":
        kernel = functools.partial(_bpr_kernel_none, gamma=gamma)
        out = pl.pallas_call(
            kernel,
            grid=(num_tiles,),
            in_specs=in_specs,
            out_specs=pl.BlockSpec((tile_b, 1), lambda i: (i, 0)),
            out_shape=jax.ShapeDtypeStruct((padded_b, 1), jnp.float32),
            compiler_params=pltpu.CompilerParams(
                dimension_semantics=("parallel",),
                vmem_limit_bytes=32 * 1024 * 1024),
            cost_estimate=cost,
        )(users_emb, pos_emb, neg_emb)
        return out[:b, 0]  # shape (b,) to match torch semantics

    inv_count = (1.0 / b) if reduction == "mean" else 1.0
    kernel = functools.partial(
        _bpr_kernel_reduce, gamma=gamma, inv_count=inv_count, b=b, tile_b=tile_b)
    out = pl.pallas_call(
        kernel,
        grid=(num_tiles,),
        in_specs=in_specs,
        # Scalar result on the scalar path: whole (1,1) output lives in SMEM,
        # resident across the sequential ("arbitrary") reduction grid.
        out_specs=pl.BlockSpec(memory_space=pltpu.MemorySpace.SMEM),
        out_shape=jax.ShapeDtypeStruct((1, 1), jnp.float32),
        compiler_params=pltpu.CompilerParams(
            dimension_semantics=("arbitrary",),
            vmem_limit_bytes=32 * 1024 * 1024),
        cost_estimate=cost,
    )(users_emb, pos_emb, neg_emb)
    return out[0, 0]


if __name__ == "__main__":
    key = jax.random.PRNGKey(0)
    k_u, k_p, k_n = jax.random.split(key, 3)

    b, d = 8, 32
    users_emb = jax.random.normal(k_u, (b, d), dtype=jnp.float32)
    pos_emb = jax.random.normal(k_p, (b, d), dtype=jnp.float32)
    neg_emb = jax.random.normal(k_n, (b, d), dtype=jnp.float32)

    # Default module config: gamma=1e-10, reduction='mean'
    loss_mean = bpr_loss(users_emb, pos_emb, neg_emb, gamma=1e-10,
                         reduction="mean")
    jax.block_until_ready(loss_mean)

    # Pure-JAX reference check
    pos_s = jnp.sum(users_emb * pos_emb, axis=1)
    neg_s = jnp.sum(users_emb * neg_emb, axis=1)
    per_row = -jnp.log(1e-10 + jax.nn.sigmoid(pos_s - neg_s))
    assert jnp.allclose(loss_mean, jnp.mean(per_row), atol=1e-5, rtol=1e-5), (
        loss_mean, jnp.mean(per_row))

    loss_sum = bpr_loss(users_emb, pos_emb, neg_emb, reduction="sum")
    jax.block_until_ready(loss_sum)
    assert jnp.allclose(loss_sum, jnp.sum(per_row), atol=1e-5, rtol=1e-5), (
        loss_sum, jnp.sum(per_row))

    loss_none = bpr_loss(users_emb, pos_emb, neg_emb, reduction="none")
    jax.block_until_ready(loss_none)
    assert jnp.allclose(loss_none, per_row, atol=1e-5, rtol=1e-5), (
        loss_none, per_row)

    print("KERNEL_OK")
</pallas_src>

<mosaic_0001>
module attributes {stable_mosaic.version = 11 : i64} {
  func.func @_bpr_kernel_reduce(%arg0: i32, %arg1: memref<8x32xf32, #tpu.memory_space<vmem>>, %arg2: memref<8x32xf32, #tpu.memory_space<vmem>>, %arg3: memref<8x32xf32, #tpu.memory_space<vmem>>, %arg4: memref<1x1xf32, #tpu.memory_space<smem>>) attributes {dimension_semantics = [#tpu.dimension_semantics<arbitrary>], iteration_bounds = array<i64: 1>, scalar_prefetch = 0 : i64, scratch_operands = 0 : i64, tpu.core_type = #tpu.core_type<tc>, window_params = [{transform_indices = @transform_0, window_bounds = array<i64: 8, 32>}, {transform_indices = @transform_1, window_bounds = array<i64: 8, 32>}, {transform_indices = @transform_2, window_bounds = array<i64: 8, 32>}, {transform_indices = @transform_3, window_bounds = array<i64: 1, 1>}]} {
    %c0_i32 = arith.constant 0 : i32
    %0 = arith.cmpi eq, %arg0, %c0_i32 : i32
    %1 = arith.extui %0 : i1 to i32
    %c0_i32_0 = arith.constant 0 : i32
    %2 = arith.cmpi ne, %1, %c0_i32_0 : i32
    scf.if %2 {
      %cst_16 = arith.constant 0.000000e+00 : f32
      %c0_17 = arith.constant 0 : index
      %c0_18 = arith.constant 0 : index
      %30 = memref.load %arg4[%c0_17, %c0_18] : memref<1x1xf32, #tpu.memory_space<smem>>
      memref.store %cst_16, %arg4[%c0_17, %c0_18] : memref<1x1xf32, #tpu.memory_space<smem>>
    } else {
    }
    %c0 = arith.constant 0 : index
    %c0_1 = arith.constant 0 : index
    %3 = vector.load %arg1[%c0, %c0_1] : memref<8x32xf32, #tpu.memory_space<vmem>>, vector<8x32xf32>
    %c0_2 = arith.constant 0 : index
    %c0_3 = arith.constant 0 : index
    %4 = vector.load %arg2[%c0_2, %c0_3] : memref<8x32xf32, #tpu.memory_space<vmem>>, vector<8x32xf32>
    %c0_4 = arith.constant 0 : index
    %c0_5 = arith.constant 0 : index
    %5 = vector.load %arg3[%c0_4, %c0_5] : memref<8x32xf32, #tpu.memory_space<vmem>>, vector<8x32xf32>
    %6 = arith.subf %4, %5 : vector<8x32xf32>
    %7 = arith.mulf %3, %6 : vector<8x32xf32>
    %cst = arith.constant dense<0.000000e+00> : vector<8xf32>
    %8 = vector.multi_reduction <add>, %7, %cst [1] : vector<8x32xf32> to vector<8xf32>
    %9 = vector.shape_cast %8 : vector<8xf32> to vector<8x1xf32>
    %10 = arith.negf %9 : vector<8x1xf32>
    %11 = math.exp %10 : vector<8x1xf32>
    %cst_6 = arith.constant 1.000000e+00 : f32
    %12 = vector.broadcast %cst_6 : f32 to vector<8x1xf32>
    %13 = arith.addf %12, %11 : vector<8x1xf32>
    %14 = arith.divf %12, %13 : vector<8x1xf32>
    %cst_7 = arith.constant 1.000000e-10 : f32
    %15 = vector.broadcast %cst_7 : f32 to vector<8x1xf32>
    %16 = arith.addf %15, %14 : vector<8x1xf32>
    %17 = math.log %16 : vector<8x1xf32>
    %cst_8 = arith.constant 0.000000e+00 : f32
    %18 = vector.broadcast %cst_8 : f32 to vector<8x1xf32>
    %19 = arith.subf %18, %17 : vector<8x1xf32>
    %c0_9 = arith.constant 0 : index
    %c0_10 = arith.constant 0 : index
    %20 = memref.load %arg4[%c0_9, %c0_10] : memref<1x1xf32, #tpu.memory_space<smem>>
    %21 = vector.shape_cast %19 : vector<8x1xf32> to vector<1x8x1xf32>
    %cst_11 = arith.constant dense<0.000000e+00> : vector<1xf32>
    %22 = vector.multi_reduction <add>, %21, %cst_11 [1, 2] : vector<1x8x1xf32> to vector<1xf32>
    %23 = vector.shape_cast %22 : vector<1xf32> to vector<1x1x1xf32>
    %24 = vector.extract %23[0, 0, 0] : f32 from vector<1x1x1xf32>
    %25 = arith.addf %20, %24 : f32
    %c0_12 = arith.constant 0 : index
    %c0_13 = arith.constant 0 : index
    %26 = memref.load %arg4[%c0_12, %c0_13] : memref<1x1xf32, #tpu.memory_space<smem>>
    memref.store %25, %arg4[%c0_12, %c0_13] : memref<1x1xf32, #tpu.memory_space<smem>>
    %c0_i32_14 = arith.constant 0 : i32
    %27 = arith.cmpi eq, %arg0, %c0_i32_14 : i32
    %28 = arith.extui %27 : i1 to i32
    %c0_i32_15 = arith.constant 0 : i32
    %29 = arith.cmpi ne, %28, %c0_i32_15 : i32
    scf.if %29 {
      %c0_16 = arith.constant 0 : index
      %c0_17 = arith.constant 0 : index
      %30 = memref.load %arg4[%c0_16, %c0_17] : memref<1x1xf32, #tpu.memory_space<smem>>
      %cst_18 = arith.constant 1.250000e-01 : f32
      %31 = arith.mulf %30, %cst_18 : f32
      %c0_19 = arith.constant 0 : index
      %c0_20 = arith.constant 0 : index
      %32 = memref.load %arg4[%c0_19, %c0_20] : memref<1x1xf32, #tpu.memory_space<smem>>
      memref.store %31, %arg4[%c0_19, %c0_20] : memref<1x1xf32, #tpu.memory_space<smem>>
    } else {
    }
    return
  }
  func.func @transform_0(%arg0: i32) -> (i32, i32) {
    %c0_i32 = arith.constant 0 : i32
    %c0_i32_0 = arith.constant 0 : i32
    return %arg0, %c0_i32 : i32, i32
  }
  func.func @transform_1(%arg0: i32) -> (i32, i32) {
    %c0_i32 = arith.constant 0 : i32
    %c0_i32_0 = arith.constant 0 : i32
    return %arg0, %c0_i32 : i32, i32
  }
  func.func @transform_2(%arg0: i32) -> (i32, i32) {
    %c0_i32 = arith.constant 0 : i32
    %c0_i32_0 = arith.constant 0 : i32
    return %arg0, %c0_i32 : i32, i32
  }
  func.func @transform_3(%arg0: i32) -> (i32, i32) {
    %c0_i32 = arith.constant 0 : i32
    %c0_i32_0 = arith.constant 0 : i32
    %c0_i32_1 = arith.constant 0 : i32
    return %c0_i32, %c0_i32_0 : i32, i32
  }
}

</mosaic_0001>

<bundles_post_ra>
// kernel: tpu_custom_call.1
= control target key start
LH: loop header
LB: loop body
LE: loop exit
PB: predicated region body
PF: predicated region fallthrough
CT: control target
= control target key end

     0   :  { %8 = vsyncpa [#allocation3], 0  ;;  %s272_s0 = inlined_call_operand.hbm [shape: f32[8,32], index: 0, kind: input, shape index: {}]   ;;  %s273_s1 = inlined_call_operand.hbm [shape: f32[8,32], index: 1, kind: input, shape index: {}]   ;;  %s274_s2 = inlined_call_operand.hbm [shape: f32[8,32], index: 2, kind: input, shape index: {}]   ;;  %s275_s3 = inlined_call_operand.hbm [shape: f32[1,1], index: 3, kind: output, shape index: {}]  }
   0x1   :  { %9 = vsyncpa [#allocation6], 0  ;;  %s27_s14 = sshll.u32 %s273_s1, 4  ;;  %s28_s14 = int_to_ptr.hbm [resolvable:$true] %s27_s14 }
   0x2   :  { %10 = vsyncpa [#allocation4], 0  ;;  %s236_s15 = smov [#allocation5]   ;;  %s16_s19 = sshll.u32 %s272_s0, 4  ;;  %s17_s19 = int_to_ptr.hbm [resolvable:$true] %s16_s19 }
   0x3   :  { %s29_s16 = sshll.u32 %s236_s15, 4  ;;  %s237_s20 = smov [#allocation2]   ;;  %s30_s16 = int_to_ptr.vmem [resolvable:$true] %s29_s16 }
   0x4   :  { %32 = dma.hbm_to_vmem [thread:$0]  %s28_s14, 128, %s30_s16, [#allocation6]  }
   0x5   :  { %s18_s21 = sshll.u32 %s237_s20, 4  ;;  %s38_s24 = sshll.u32 %s274_s2, 4  ;;  %s19_s21 = int_to_ptr.vmem [resolvable:$true] %s18_s21  ;;  %s39_s24 = int_to_ptr.hbm [resolvable:$true] %s38_s24 }
   0x6   :  { %21 = dma.hbm_to_vmem [thread:$0]  %s17_s19, 128, %s19_s21, [#allocation3]  }
   0x7   :  { %s238_s1 = smov [#allocation7]  }
   0x8   :  { %s40_s25 = sshll.u32 %s238_s1, 4  ;;  %s41_s25 = int_to_ptr.vmem [resolvable:$true] %s40_s25 }
   0x9   :  { %43 = dma.hbm_to_vmem [thread:$0]  %s39_s24, 128, %s41_s25, [#allocation6]  }
   0xa   :  { %230 = dma.done.wait [#allocation3], 128  }
   0xb   :  { %231 = vsyncadd [#allocation3], 4294967168 }
   0xc   :  { %232 = dma.done.wait [#allocation6], 256  }
   0xd   :  { %233 = vsyncadd [#allocation6], 4294967040  ;;  %v62_v0 = vld [vmem:[#allocation2] sm:$0xff]  ;;  %v63_v1 = vld [vmem:[#allocation5] sm:$0xff]  ;;  %vm67_vm0 = vcmask 261120   ;;  %vm95_vm5 = vcmask 7168  }
   0xe   :  { %v64_v2 = vld [vmem:[#allocation7] sm:$0xff]  ;;  %s120_s26 = sshll.u32 %s275_s3, 4  ;;  %s239_s29 = smov [#allocation8]   ;;  %s121_s26 = int_to_ptr.hbm [resolvable:$true] %s120_s26 }
   0xf   :  { %v65_v3 = vsub.f32 %v63_v1, %v64_v2 }
  0x11   :  { %v66_v4 = vmul.f32 %v65_v3, %v62_v0 }
  0x13   :  { %v68_v5 = vsel %vm67_vm0, %v66_v4, 0.0 }
  0x14   :  { %69 = vadd.xlane.f32.xlu0 %v68_v5 }
  0x87   :  { %v70_v6 = vpop.xlane.xlu0 %69 }
  0x88   :  { %v132_v7 = vmul.f32 -1.442695, %v70_v6 }
  0x8a   :  { %140 = vpow2.f32 %v132_v7 }
  0x90   :  { %v141_v8 = vpop.eup %140 }
  0x91   :  { %v74_v9 = vadd.f32 1.0, %v141_v8 }
  0x93   :  { %142 = vrcp.f32 %v74_v9  ;;  %v86_v13 = vand.u32 2147483648, %v74_v9  ;;  %v84_v15 = vand.u32 2147483647, %v74_v9  ;;  %vm80_vm2 = vweird.f32 %v74_v9 }
  0x95   :  { %v87_v17 = vor.u32 1.1754944e-38, %v86_v13  ;;  %vm85_vm4 = vcmp.eq.f32.partialorder %v84_v15, 8.507059e+37 }
  0x99   :  { %v143_v10 = vpop.eup %142 }
  0x9a   :  { %v76_v11 = vmul.f32 %v143_v10, %v74_v9  ;;  %vm81_vm1 = vweird.f32 %v143_v10 }
  0x9b   :  { %vm82_vm3 = vmor %vm80_vm2, %vm81_vm1 }
  0x9c   :  { %v77_v12 = vsub.f32 1.0, %v76_v11 }
  0x9e   :  { %v78_v14 = vmul.f32 %v143_v10, %v77_v12 }
  0xa0   :  { %v79_v16 = vadd.f32 %v143_v10, %v78_v14 }
  0xa2   :  { %v83_v18 = vsel %vm82_vm3, %v143_v10, %v79_v16 }
  0xa3   :  { %v88_v19 = vsel %vm85_vm4, %v87_v17, %v83_v18 }
  0xa4   :  { %v90_v20 = vadd.f32 1e-10, %v88_v19 }
  0xa6   :  { %144 = vlog2.f32 %v90_v20 }
  0xac   :  { %v145_v21 = vpop.eup %144 }
  0xad   :  { %v92_v22 = vmul.f32 0.6931472, %v145_v21 }
  0xaf   :  { %v93_v23 = vsub.f32 0.0, %v92_v22 }
  0xb1   :  { %v96_v24 = vsel %vm95_vm5, %v93_v23, 0.0 }
  0xb2   :  { %97 = vadd.xlane.f32.xlu0 %v96_v24 }
 0x125   :  { %v98_v25 = vpop.xlane.xlu0 %97 }
 0x126   :  { %v99_v26 = vrot.slane %v98_v25, 4 }
 0x128   :  { %v100_v27 = vadd.f32 %v99_v26, %v98_v25 }
 0x12a   :  { %v101_v28 = vrot.slane %v100_v27, 2 }
 0x12c   :  { %v102_v29 = vadd.f32 %v101_v28, %v100_v27 }
 0x12e   :  { %v103_v30 = vrot.slane %v102_v29, 1 }
 0x130   :  { %v104_v31 = vadd.f32 %v103_v30, %v102_v29 }
 0x132   :  { %133 = vpush %v104_v31 }
 0x163   :  { %s134_s27 = spop %133 }
 0x164   :  { %s113_s28 = smul.f32 0.125, %s134_s27 }
 0x166   :  { %114 = sst [smem:[#allocation8]] %s113_s28 }
 0x167   :  { %123 = dma.smem_to_hbm %s239_s29, 16, %s121_s26, [#allocation4]  }
 0x168   :  { %234 = dma.done.wait [#allocation4], 16  }
 0x169   :  { %235 = vsyncadd [#allocation4], 4294967280 }
 0x16a   :  { %128 = sfence }
 0x16b   :  { %129 = vsyncpa [#allocation3], 1 }
 0x16c   :  { %130 = vsyncpa [#allocation6], 1 }
 0x16d   :  { %131 = vsyncpa [#allocation4], 1 }

</bundles_post_ra>
